<compile_context>
chip_gen: v7x
topology: tpu7x:2x2x1
jax: 0.10.0
libtpu: 0.0.40
codegen_flags: <defaults>
</compile_context>

<pallas_src>
import functools

import jax
import jax.numpy as jnp
from jax.experimental import pallas as pl
from jax.experimental.pallas import tpu as pltpu


def _round_up(x, m):
    return ((x + m - 1) // m) * m


_GATE_LANE = 64  # blend-mask (gate) logits packed at lanes 64:67 of the head
                 # weight; roll-by-64 is its own inverse mod 128.


# --------------------------------------------------------------------------
# Device query (tile sizing only)
# --------------------------------------------------------------------------

_SINGLE_TC_CACHE = None


def _single_tc():
    """True on 1-TensorCore chips (v5e/v6e): the grid is a serial loop there,
    so splitting M only adds per-step overhead.  Multi-TC parts (v7x) want
    >=2 M-blocks per core so the A-tile DMA overlaps compute."""
    global _SINGLE_TC_CACHE
    if _SINGLE_TC_CACHE is None:
        try:
            kind = jax.devices()[0].device_kind.lower()
        except Exception:
            kind = ""
        _SINGLE_TC_CACHE = any(
            s in kind for s in ("v5 lite", "v5e", "v5litepod", "v6 lite", "v6e"))
    return _SINGLE_TC_CACHE


def _pick_tm(M):
    M8 = _round_up(M, 8)
    if _single_tc():
        # Biggest tile that comfortably fits VMEM (512x1755 bf16 ~ 1.8 MB).
        return min(M8, 512)
    # Multi-TensorCore: >=4 M-blocks when M is large enough (2 per core).
    if M8 <= 128:
        return M8
    if M8 <= 512:
        return 128
    return 256


# --------------------------------------------------------------------------
# Pallas kernels
# --------------------------------------------------------------------------

def _mm_kernel(a_ref, b_ref, bias_ref, o_ref, *, slope):
    """Whole-K matmul: out = act(a @ b + bias); bf16 operands, f32 accum."""
    out = jnp.dot(a_ref[...], b_ref[...], preferred_element_type=jnp.float32)
    out = out + bias_ref[...]                       # (tm,tn) + (1,tn)
    if slope is not None:                           # LeakyReLU epilogue (f32)
        out = jnp.where(out >= 0, out, slope * out)
    o_ref[...] = out.astype(o_ref.dtype)


def _head_kernel(a_ref, b_ref, o_ref):
    """Fused cat2 head -- ONE MXU dot.

    Packed weight columns: [0:3]=unmasked flow, [3:12]=mask logits,
    [64:67]=blend-mask (gate) logits, rest zero.
    Epilogue (f32, lane-masked):
        lanes 0:3  -> unmasked * sigmoid(gate)         (future_frame)
        lanes 3:12 -> softmax over the 9 mask logits   (future_frame_masks)
    """
    x = jnp.dot(a_ref[...], b_ref[...], preferred_element_type=jnp.float32)
    lane = jax.lax.broadcasted_iota(jnp.int32, x.shape, 1)
    in_masks = jnp.logical_and(lane >= 3, lane < 12)

    # softmax over lanes 3..11; other lanes forced to exp(-huge) = 0 exactly,
    # so no inf/NaN is ever produced on the unmasked lanes.
    xm = jnp.where(in_masks, x, -1e30)
    m = jnp.max(xm, axis=-1, keepdims=True)
    e = jnp.exp(xm - m)
    sm = e / jnp.sum(e, axis=-1, keepdims=True)

    # gate logits live at lanes 64:67 -> roll by 64 (XLU) to align with 0:3.
    g = pltpu.roll(x, shift=_GATE_LANE, axis=1)
    frame = x * jax.nn.sigmoid(g)

    o_ref[...] = jnp.where(lane < 3, frame, sm).astype(o_ref.dtype)


# --------------------------------------------------------------------------
# Pallas wrappers
# --------------------------------------------------------------------------

def pallas_matmul_bias_act(a, b, bias=None, slope=None, out_dtype=jnp.bfloat16):
    """out = act(a @ b + bias).  a:[M,K], b:[K,N] (N % 128 == 0), whole-K blocks."""
    M, K = a.shape
    K2, N = b.shape
    assert K == K2 and N % 128 == 0
    if a.dtype != jnp.bfloat16:
        a = a.astype(jnp.bfloat16)
    if b.dtype != jnp.bfloat16:
        b = b.astype(jnp.bfloat16)
    if bias is None:
        bias = jnp.zeros((1, N), jnp.float32)

    tm = _pick_tm(M)
    Mp = _round_up(M, tm)
    if Mp != M:
        a = jnp.pad(a, ((0, Mp - M), (0, 0)))
    tn = min(256, N)

    out = pl.pallas_call(
        functools.partial(_mm_kernel, slope=slope),
        out_shape=jax.ShapeDtypeStruct((Mp, N), out_dtype),
        grid=(Mp // tm, N // tn),
        in_specs=[
            pl.BlockSpec((tm, K), lambda i, j: (i, 0)),   # K == full dim
            pl.BlockSpec((K, tn), lambda i, j: (0, j)),
            pl.BlockSpec((1, tn), lambda i, j: (0, j)),
        ],
        out_specs=pl.BlockSpec((tm, tn), lambda i, j: (i, j)),
        compiler_params=pltpu.CompilerParams(
            dimension_semantics=("parallel", "parallel")),
    )(a, b, bias)
    return out[:M] if Mp != M else out


def pallas_fused_head(cols, b_all):
    """cols:[M,K] bf16; b_all:[K,128] bf16 packed head weight. Returns (M,128) f32."""
    M, K = cols.shape
    if cols.dtype != jnp.bfloat16:
        cols = cols.astype(jnp.bfloat16)
    tm = _pick_tm(M)
    Mp = _round_up(M, tm)
    if Mp != M:
        cols = jnp.pad(cols, ((0, Mp - M), (0, 0)))
    out = pl.pallas_call(
        _head_kernel,
        out_shape=jax.ShapeDtypeStruct((Mp, 128), jnp.float32),
        grid=(Mp // tm,),
        in_specs=[
            pl.BlockSpec((tm, K), lambda i: (i, 0)),
            pl.BlockSpec((K, 128), lambda i: (0, 0)),
        ],
        out_specs=pl.BlockSpec((tm, 128), lambda i: (i, 0)),
        compiler_params=pltpu.CompilerParams(
            dimension_semantics=("parallel",)),
    )(cols, b_all)
    return out[:M] if Mp != M else out


# --------------------------------------------------------------------------
# im2col / depth-to-space helpers (all 3x3 stride-1 pad-1 after lowering)
# --------------------------------------------------------------------------

def _im2col(x, kh=3, kw=3, stride=1, pad=1):
    """x: NHWC -> ([B*Ho*Wo, kh*kw*C], (B, Ho, Wo)).
    TODO(synk): fold into the kernel (shifted pl.ds reads over taps)."""
    B, H, W, C = x.shape
    xp = jnp.pad(x, ((0, 0), (pad, pad), (pad, pad), (0, 0)))
    Ho = (H + 2 * pad - kh) // stride + 1
    Wo = (W + 2 * pad - kw) // stride + 1
    patches = []
    for i in range(kh):
        for j in range(kw):
            patches.append(
                xp[:, i:i + (Ho - 1) * stride + 1:stride,
                   j:j + (Wo - 1) * stride + 1:stride, :])
    cols = jnp.concatenate(patches, axis=-1)          # [B,Ho,Wo,kh*kw*C]
    return cols.reshape(B * Ho * Wo, kh * kw * C), (B, Ho, Wo)


def _depth_to_space2(y, cout):
    """(B,H,W,4*cout) with channel = (pr*2+pc)*cout+co -> (B,2H,2W,cout)."""
    B, H, W, _ = y.shape
    y = y.reshape(B, H, W, 2, 2, cout)
    y = jnp.transpose(y, (0, 1, 3, 2, 4, 5))
    return y.reshape(B, 2 * H, 2 * W, cout)


def _leaky(x, slope):
    return jnp.where(x >= 0, x, slope * x)


def _matmul_any(cols, wmat, bias=None, slope=None, out_dtype=jnp.bfloat16):
    """Route to Pallas when the tile is worth it, else plain jnp.dot (bf16 MXU)."""
    M, K = cols.shape
    K2, N = wmat.shape
    assert K == K2
    if M >= 128 and N % 128 == 0:
        return pallas_matmul_bias_act(cols, wmat, bias, slope, out_dtype)
    # Tiny layer: a padded 128x128 Pallas tile would be >95% wasted work.
    out = jnp.dot(cols, wmat, preferred_element_type=jnp.float32)
    if bias is not None:
        out = out + bias
    if slope is not None:
        out = _leaky(out, slope)
    return out.astype(out_dtype)


def crop_like(x, target):
    return x[:, :target.shape[1], :target.shape[2], :]


# --------------------------------------------------------------------------
# One-time weight preparation (hoisted out of the traced forward)
# --------------------------------------------------------------------------

def torch_conv_weight(w):
    """PyTorch Conv2d weight (cout,cin,kh,kw) -> (kh,kw,cin,cout)."""
    return jnp.transpose(w, (2, 3, 1, 0))


def deconv4s2p1_to_conv_weight(w):
    """ConvTranspose2d(k=4,s=2,p=1) torch weight (cin,cout,4,4) -> equivalent
    stride-1 3x3 conv weight (3,3,cin,4*cout) feeding a 2x2 depth-to-space.

    For output parity (pr,pc) and window tap (tr,tc) = (pr+dr, pc+dc),
    the transposed-conv tap used is (kh,kw) = (3-pr-2*dr, 3-pc-2*dc);
    the remaining 5 of the 9 window taps per parity are structurally zero.
    """
    cin, cout, _, _ = w.shape
    wb = jnp.zeros((3, 3, cin, 4, cout), w.dtype)
    for pr in range(2):
        for pc in range(2):
            p = pr * 2 + pc
            for dr in range(2):
                for dc in range(2):
                    tr, tc = pr + dr, pc + dc
                    kh, kw = 3 - pr - 2 * dr, 3 - pc - 2 * dc
                    wb = wb.at[tr, tc, :, p, :].set(w[:, :, kh, kw])
    return wb.reshape(3, 3, cin, 4 * cout)


def prepare_params(params):
    """Torch-layout weights -> matmul-ready bf16 (K,N) matrices, done ONCE."""
    def conv_mat(w):            # Conv2d (cout,cin,3,3) -> (9*cin, cout)
        return torch_conv_weight(w).reshape(-1, w.shape[0])

    def deconv_mat(w):          # ConvTranspose2d (cin,cout,4,4) -> (9*cin, 4*cout)
        return deconv4s2p1_to_conv_weight(w).reshape(-1, 4 * w.shape[1])

    bf = lambda a: a.astype(jnp.bfloat16)

    prep = {
        "optical_flow_conv": bf(conv_mat(params["optical_flow_conv.w"])),
        "optical_flow_conv.b":
            params["optical_flow_conv.b"].reshape(1, -1).astype(jnp.float32),
        "img_deconv6": bf(deconv_mat(params["img_deconv6.w"])),
        "img_deconv5": bf(deconv_mat(params["img_deconv5.w"])),
        "img_deconv4": bf(deconv_mat(params["img_deconv4.w"])),
        "img_deconv3": bf(deconv_mat(params["img_deconv3.w"])),
        "img_deconv2": bf(deconv_mat(params["img_deconv2.w"])),
        "up6_to_5": bf(deconv_mat(params["upsampled_optical_flow6_to_5.w"])),
        "up5_to_4": bf(deconv_mat(params["upsampled_optical_flow5_to_4.w"])),
        "up4_to_3": bf(deconv_mat(params["upsampled_optical_flow4_to_3.w"])),
        "up3_to_2": bf(deconv_mat(params["upsampled_optical_flow3_to_2.w"])),
        "predict_optical_flow6": bf(conv_mat(params["predict_optical_flow6.w"])),
        "predict_optical_flow5": bf(conv_mat(params["predict_optical_flow5.w"])),
        "predict_optical_flow4": bf(conv_mat(params["predict_optical_flow4.w"])),
        "predict_optical_flow3": bf(conv_mat(params["predict_optical_flow3.w"])),
    }
    # Fused head weight: one (891,128) bf16 operand, one MXU dot.
    kh = 9 * params["predict_optical_flow2.w"].shape[1]
    b_all = jnp.zeros((kh, 128), jnp.float32)
    b_all = b_all.at[:, 0:3].set(conv_mat(params["predict_optical_flow2.w"]))
    b_all = b_all.at[:, 3:12].set(conv_mat(params["predict_optical_flow2_masks.w"]))
    b_all = b_all.at[:, _GATE_LANE:_GATE_LANE + 3].set(
        conv_mat(params["predict_optical_flow2_mask.w"]))
    prep["head"] = bf(b_all)
    return prep


# --------------------------------------------------------------------------
# Parameters (deterministic, matching the module's __init__ shapes)
# --------------------------------------------------------------------------

def init_params(seed=0):
    key = jax.random.PRNGKey(seed)
    params = {}

    def nk():
        nonlocal key
        key, sub = jax.random.split(key)
        return sub

    def conv_w(cout, cin, k):                       # Conv2d weight
        std = (2.0 / (cin * k * k)) ** 0.5
        return std * jax.random.normal(nk(), (cout, cin, k, k), jnp.float32)

    def deconv_w(cin, cout, k=4):                   # ConvTranspose2d weight
        std = (2.0 / (cin * k * k)) ** 0.5
        return std * jax.random.normal(nk(), (cin, cout, k, k), jnp.float32)

    params["optical_flow_conv.w"] = conv_w(256, 128, 3)
    params["optical_flow_conv.b"] = 0.01 * jax.random.normal(nk(), (256,), jnp.float32)
    params["img_deconv6.w"] = deconv_w(256, 128)
    params["img_deconv5.w"] = deconv_w(128, 64)
    params["img_deconv4.w"] = deconv_w(195, 64)
    params["img_deconv3.w"] = deconv_w(195, 64)
    params["img_deconv2.w"] = deconv_w(195, 32)
    params["predict_optical_flow6.w"] = conv_w(3, 128, 3)
    params["predict_optical_flow5.w"] = conv_w(3, 195, 3)
    params["predict_optical_flow4.w"] = conv_w(3, 195, 3)
    params["predict_optical_flow3.w"] = conv_w(3, 195, 3)
    params["predict_optical_flow2.w"] = conv_w(3, 99, 3)
    params["upsampled_optical_flow6_to_5.w"] = deconv_w(3, 3)
    params["upsampled_optical_flow5_to_4.w"] = deconv_w(3, 3)
    params["upsampled_optical_flow4_to_3.w"] = deconv_w(3, 3)
    params["upsampled_optical_flow3_to_2.w"] = deconv_w(3, 3)
    params["upsample_conv.w"] = deconv_w(99, 99)
    params["predict_optical_flow2_masks.w"] = conv_w(9, 99, 3)
    params["predict_optical_flow2_mask.w"] = conv_w(3, 99, 3)
    params["deconv_out1.w"] = deconv_w(128, 64)
    params["deconv_out2.w"] = deconv_w(64, 32)
    params["deconv_out3.w"] = deconv_w(32, 16)
    params["conv_pred.w"] = conv_w(3, 16, 3)
    params["conv_mask.w"] = conv_w(3, 16, 3)
    params["conv_masks.w"] = conv_w(9, 16, 3)
    return params


# --------------------------------------------------------------------------
# Forward pass (default configuration: use_skip_layers=4)
# --------------------------------------------------------------------------

def future_frame_decoder_forward(prep, tiled_feat, img_out_convs):
    bf16 = jnp.bfloat16
    nchw2nhwc = lambda t: jnp.transpose(t, (0, 2, 3, 1)).astype(bf16)
    nhwc2nchw = lambda t: jnp.transpose(t, (0, 3, 1, 2))

    c2, c3, c4, c5, _c6 = [nchw2nhwc(t) for t in img_out_convs]
    x = nchw2nhwc(tiled_feat)

    def cols_of(t):
        return _im2col(t, 3, 3, 1, 1)

    def mm(cols, shape_bhw, wmat, bias=None, slope=None):
        B, H, W = shape_bhw
        return _matmul_any(cols, wmat, bias, slope).reshape(B, H, W, -1)

    def d2s(y):
        return _depth_to_space2(y, y.shape[-1] // 4)

    # conv2d(128,256,3,1): Conv2d(pad=1, bias=True) + LeakyReLU(0.1)
    cols, s = cols_of(x)
    of_f2 = mm(cols, s, prep["optical_flow_conv"], prep["optical_flow_conv.b"], 0.1)
    # img_deconv6: ConvTranspose2d(k4,s2,p1,bias=False) + LeakyReLU(0.1)
    cols, s = cols_of(of_f2)
    of_feat = d2s(mm(cols, s, prep["img_deconv6"], None, 0.1))

    # level 6 -> 5: flow6 and img_deconv5 share one im2col of of_feat
    cols, s = cols_of(of_feat)
    flow6 = mm(cols, s, prep["predict_optical_flow6"])
    d5 = d2s(mm(cols, s, prep["img_deconv5"], None, 0.1))
    cols, s = cols_of(flow6)
    flow6_up = d2s(mm(cols, s, prep["up6_to_5"]))
    cat5 = jnp.concatenate([c5, crop_like(d5, c5), crop_like(flow6_up, c5)], axis=-1)

    # level 5 -> 4: flow5 and img_deconv4 share one im2col of cat5
    cols, s = cols_of(cat5)
    flow5 = mm(cols, s, prep["predict_optical_flow5"])
    d4 = d2s(mm(cols, s, prep["img_deconv4"], None, 0.1))
    cols, s = cols_of(flow5)
    flow5_up = d2s(mm(cols, s, prep["up5_to_4"]))
    cat4 = jnp.concatenate([c4, crop_like(d4, c4), crop_like(flow5_up, c4)], axis=-1)

    # level 4 -> 3
    cols, s = cols_of(cat4)
    flow4 = mm(cols, s, prep["predict_optical_flow4"])
    d3 = d2s(mm(cols, s, prep["img_deconv3"], None, 0.1))
    cols, s = cols_of(flow4)
    flow4_up = d2s(mm(cols, s, prep["up4_to_3"]))
    cat3 = jnp.concatenate([c3, crop_like(d3, c3), crop_like(flow4_up, c3)], axis=-1)

    # level 3 -> 2
    cols, s = cols_of(cat3)
    flow3 = mm(cols, s, prep["predict_optical_flow3"])
    d2 = d2s(mm(cols, s, prep["img_deconv2"], None, 0.1))
    cols, s = cols_of(flow3)
    flow3_up = d2s(mm(cols, s, prep["up3_to_2"]))
    cat2 = jnp.concatenate([c2, d2, flow3_up], axis=-1)          # 99 ch

    # fused head: ONE Pallas matmul + sigmoid-blend / softmax epilogue
    cols, (Bc, H2, W2) = cols_of(cat2)
    head = pallas_fused_head(cols, prep["head"])                 # (M,128) f32
    frame = head[:, 0:3].reshape(Bc, H2, W2, 3)      # unmasked * sigmoid(mask)
    masks = head[:, 3:12].reshape(Bc, H2, W2, 9)     # softmax over 9 channels

    return nhwc2nchw(masks), nhwc2nchw(frame)


# --------------------------------------------------------------------------
# Self-checks
# --------------------------------------------------------------------------

def _validate_deconv_mapping():
    """Check the sub-pixel lowering against the lhs-dilated-conv identity for
    torch.nn.ConvTranspose2d(k=4, s=2, p=1, bias=False)."""
    k1, k2 = jax.random.split(jax.random.PRNGKey(42))
    cin, cout, H, W = 5, 7, 3, 4
    x = jax.random.normal(k1, (1, cin, H, W), jnp.float32)
    w = jax.random.normal(k2, (cin, cout, 4, 4), jnp.float32)
    # reference: transposed conv == lhs-dilated conv with spatially flipped
    # kernel and swapped in/out channel dims, padding = k-1-p = 2.
    w_ref = jnp.transpose(jnp.flip(w, (2, 3)), (1, 0, 2, 3))      # (cout,cin,4,4)
    ref = jax.lax.conv_general_dilated(
        x, w_ref, window_strides=(1, 1), padding=((2, 2), (2, 2)),
        lhs_dilation=(2, 2), dimension_numbers=("NCHW", "OIHW", "NCHW"),
        precision=jax.lax.Precision.HIGHEST)
    # ours: stride-1 3x3 conv with the sub-pixel weight, then depth-to-space
    wc = deconv4s2p1_to_conv_weight(w)                            # (3,3,cin,4*cout)
    x_nhwc = jnp.transpose(x, (0, 2, 3, 1))
    y = jax.lax.conv_general_dilated(
        x_nhwc, wc, window_strides=(1, 1), padding=((1, 1), (1, 1)),
        dimension_numbers=("NHWC", "HWIO", "NHWC"),
        precision=jax.lax.Precision.HIGHEST)
    got = jnp.transpose(_depth_to_space2(y, cout), (0, 3, 1, 2))
    assert bool(jnp.allclose(got, ref, atol=1e-4)), "deconv sub-pixel mapping mismatch"


def _validate_pallas_kernels():
    """Numerical parity of the Pallas matmul and fused-head kernels vs jnp."""
    ka, kb = jax.random.split(jax.random.PRNGKey(7))
    a = jax.random.normal(ka, (160, 891), jnp.float32).astype(jnp.bfloat16)
    b = jax.random.normal(kb, (891, 128), jnp.float32).astype(jnp.bfloat16)
    got = pallas_matmul_bias_act(a, b, None, 0.1, out_dtype=jnp.float32)
    ref = _leaky(jnp.dot(a, b, preferred_element_type=jnp.float32), 0.1)
    assert bool(jnp.allclose(got, ref, atol=1e-2, rtol=1e-2)), "matmul kernel mismatch"

    kc, kd = jax.random.split(jax.random.PRNGKey(11))
    a = jax.random.normal(kc, (136, 891), jnp.float32).astype(jnp.bfloat16)
    b = (0.05 * jax.random.normal(kd, (891, 128), jnp.float32)).astype(jnp.bfloat16)
    got = pallas_fused_head(a, b)
    xr = jnp.dot(a, b, preferred_element_type=jnp.float32)
    frame_ref = xr[:, 0:3] * jax.nn.sigmoid(xr[:, _GATE_LANE:_GATE_LANE + 3])
    masks_ref = jax.nn.softmax(xr[:, 3:12], axis=-1)
    assert bool(jnp.allclose(got[:, 0:3], frame_ref, atol=2e-2, rtol=2e-2)), \
        "head frame mismatch"
    assert bool(jnp.allclose(got[:, 3:12], masks_ref, atol=2e-3)), "head softmax mismatch"


# --------------------------------------------------------------------------

if __name__ == "__main__":
    _validate_deconv_mapping()
    _validate_pallas_kernels()

    params = init_params(0)
    prep = jax.jit(prepare_params)(params)      # one-time weight prep (hoisted)

    key = jax.random.PRNGKey(0)
    ks = jax.random.split(key, 6)
    B = 2
    # tiled_feat and encoder skip connections (NCHW, matching PyTorch):
    tiled_feat = jax.random.normal(ks[0], (B, 128, 1, 1), jnp.float32)
    out_img_conv2 = jax.random.normal(ks[1], (B, 64, 32, 32), jnp.float32)
    out_img_conv3 = jax.random.normal(ks[2], (B, 128, 16, 16), jnp.float32)
    out_img_conv4 = jax.random.normal(ks[3], (B, 128, 8, 8), jnp.float32)
    out_img_conv5 = jax.random.normal(ks[4], (B, 128, 4, 4), jnp.float32)
    out_img_conv6 = jax.random.normal(ks[5], (B, 256, 2, 2), jnp.float32)
    img_out_convs = (out_img_conv2, out_img_conv3, out_img_conv4,
                     out_img_conv5, out_img_conv6)

    fwd = jax.jit(future_frame_decoder_forward)
    future_frame_masks, future_frame = fwd(prep, tiled_feat, img_out_convs)
    jax.block_until_ready((future_frame_masks, future_frame))

    assert future_frame_masks.shape == (B, 9, 32, 32)
    assert future_frame.shape == (B, 3, 32, 32)
    assert bool(jnp.all(jnp.isfinite(future_frame)))
    assert bool(jnp.all(jnp.isfinite(future_frame_masks)))
    # channel softmax sums to 1
    assert bool(jnp.allclose(jnp.sum(future_frame_masks, axis=1), 1.0, atol=1e-5))

    print("KERNEL_OK")
</pallas_src>

<mosaic_0001>
module attributes {stable_mosaic.version = 11 : i64} {
  func.func @_mm_kernel(%arg0: i32, %arg1: i32, %arg2: memref<128x891xbf16, #tpu.memory_space<vmem>>, %arg3: memref<891x128xbf16, #tpu.memory_space<vmem>>, %arg4: memref<1x128xf32, #tpu.memory_space<vmem>>, %arg5: memref<128x128xf32, #tpu.memory_space<vmem>>) attributes {dimension_semantics = [#tpu.dimension_semantics<parallel>, #tpu.dimension_semantics<parallel>], iteration_bounds = array<i64: 2, 1>, scalar_prefetch = 0 : i64, scratch_operands = 0 : i64, tpu.core_type = #tpu.core_type<tc>, window_params = [{transform_indices = @transform_0, window_bounds = array<i64: 128, 891>}, {transform_indices = @transform_1, window_bounds = array<i64: 891, 128>}, {transform_indices = @transform_2, window_bounds = array<i64: 1, 128>}, {transform_indices = @transform_3, window_bounds = array<i64: 128, 128>}]} {
    %c0 = arith.constant 0 : index
    %c0_0 = arith.constant 0 : index
    %0 = vector.load %arg2[%c0, %c0_0] : memref<128x891xbf16, #tpu.memory_space<vmem>>, vector<128x891xbf16>
    %c0_1 = arith.constant 0 : index
    %c0_2 = arith.constant 0 : index
    %1 = vector.load %arg3[%c0_1, %c0_2] : memref<891x128xbf16, #tpu.memory_space<vmem>>, vector<891x128xbf16>
    %cst = arith.constant dense<0.000000e+00> : vector<128x128xf32>
    %2 = tpu.matmul %0, %1, %cst {dimension_numbers = #tpu.dot_dimension_numbers<[1], [0], [0], [1], [0, 0, 1, 1], [], []>} : vector<128x891xbf16>, vector<891x128xbf16>, vector<128x128xf32> -> vector<128x128xf32>
    %c0_3 = arith.constant 0 : index
    %c0_4 = arith.constant 0 : index
    %3 = vector.load %arg4[%c0_3, %c0_4] : memref<1x128xf32, #tpu.memory_space<vmem>>, vector<1x128xf32>
    %4 = vector.broadcast %3 : vector<1x128xf32> to vector<128x128xf32>
    %5 = arith.addf %2, %4 : vector<128x128xf32>
    %cst_5 = arith.constant 0.000000e+00 : f32
    %6 = vector.broadcast %cst_5 : f32 to vector<128x128xf32>
    %7 = arith.cmpf oge, %5, %6 : vector<128x128xf32>
    %cst_6 = arith.constant 1.000000e-01 : f32
    %8 = vector.broadcast %cst_6 : f32 to vector<128x128xf32>
    %9 = arith.mulf %8, %5 : vector<128x128xf32>
    %10 = arith.select %7, %5, %9 : vector<128x128xi1>, vector<128x128xf32>
    %c0_7 = arith.constant 0 : index
    %c0_8 = arith.constant 0 : index
    %11 = vector.load %arg5[%c0_7, %c0_8] : memref<128x128xf32, #tpu.memory_space<vmem>>, vector<128x128xf32>
    tpu.vector_store %arg5[%c0_7, %c0_8], %10 {strides = array<i32>} : memref<128x128xf32, #tpu.memory_space<vmem>>, vector<128x128xf32>,
    return
  }
  func.func @transform_0(%arg0: i32, %arg1: i32) -> (i32, i32) {
    %c0_i32 = arith.constant 0 : i32
    %c0_i32_0 = arith.constant 0 : i32
    return %arg0, %c0_i32 : i32, i32
  }
  func.func @transform_1(%arg0: i32, %arg1: i32) -> (i32, i32) {
    %c0_i32 = arith.constant 0 : i32
    %c0_i32_0 = arith.constant 0 : i32
    return %c0_i32, %arg1 : i32, i32
  }
  func.func @transform_2(%arg0: i32, %arg1: i32) -> (i32, i32) {
    %c0_i32 = arith.constant 0 : i32
    %c0_i32_0 = arith.constant 0 : i32
    return %c0_i32, %arg1 : i32, i32
  }
  func.func @transform_3(%arg0: i32, %arg1: i32) -> (i32, i32) {
    %c0_i32 = arith.constant 0 : i32
    return %arg0, %arg1 : i32, i32
  }
}

</mosaic_0001>

<bundles_post_ra>
// kernel: tpu_custom_call.1
= control target key start
LH: loop header
LB: loop body
LE: loop exit
PB: predicated region body
PF: predicated region fallthrough
CT: control target
= control target key end

     0   :  { %8 = vsyncpa [#allocation3], 0  ;;  %s2801_s0 = inlined_call_operand.hbm [shape: bf16[256,891], index: 0, kind: input, shape index: {}]   ;;  %s2802_s1 = inlined_call_operand.hbm [shape: bf16[891,128], index: 1, kind: input, shape index: {}]   ;;  %s2803_s2 = inlined_call_operand.vmem [shape: f32[1,128], index: 2, kind: input, shape index: {}]   ;;  %s2804_s3 = inlined_call_operand.hbm [shape: f32[256,128], index: 3, kind: output, shape index: {}]  }
   0x1   :  { %10 = vsyncpa [#allocation3 + $0x1], 0 }
   0x2   :  { %11 = vsyncpa [#allocation6], 0 }
   0x3   :  { %12 = vsyncpa [#allocation4], 0 }
   0x4   :  { %14 = vsyncpa [#allocation4 + $0x1], 0  ;;  %s2421_s12 = smov 0   ;;  %s2423_s13 = smov 0  }
   0x5   :  { %s2425_s14 = smov 0   ;;  %s2427_s15 = smov 0  }
   0x6   :  { %s2429_s16 = smov 0   ;;  %s2431_s17 = smov 0  }
   0x7 LB: > { %s1647_s18 = sadd.s32 4294967295, %s2389_s17   ;;  %s1648_s19 = sadd.s32 4294967294, %s2389_s17   ;;  %s2389_s17 = sphi %s2431_s17, %s20_s17   ;;  %s2385_s16 = sphi %s2429_s16, %s2827_s16   ;;  %s2381_s15 = sphi %s2427_s15, %s2826_s15   ;;  %s2377_s14 = sphi %s2425_s14, %s2825_s14   ;;  %s2373_s13 = sphi %s2423_s13, %s2824_s13   ;;  %s2369_s12 = sphi %s2421_s12, %s2823_s12  }
   0x8   : > { %p52_p0 = scmp.ne.s32.totalorder %s2373_s13, %s2369_s12  ;;  %p2455_p1 = scmp.eq.s32.totalorder %s1647_s18, 0 }
   0x9   : > { %p2459_p2 = scmp.eq.s32.totalorder %s1647_s18, 1  ;;  %p136_p3 = scmp.eq.s32.totalorder %s1648_s19, 1 }
   0xa   : > { %s2809_s20 = scalar_select %p2455_p1, 1, 0 }
   0xb   : > { %s2810_s21 = scalar_select %p2459_p2, 1, 0 }
   0xc   : > { %p2465_p4 = por %p2455_p1, %p52_p0  ;;  %p1649_p5 = scmp.ge.s32.totalorder %s2389_s17, 1 }
   0xd   : > { %p2470_p6 = por %p136_p3, %p52_p0  ;;  %p143_p7 = scmp.lt.s32.totalorder %s2389_s17, 3 }
   0xe   : > { %s2811_s22 = scalar_select %p2465_p4, 1, 0 }
   0xf   : > { %s2812_s23 = scalar_select %p2470_p6, 1, 0 }
  0x10   : > { %p2475_p8 = pnand %p1649_p5, %p143_p7  ;;  %s2391_s25 = smov [#allocation5]  }
  0x11   : > { %s157_s26 = sshll.u32 %s2391_s25, 4  ;;  %s32_s28 = sadd.s32 1, %s2385_s16  ;;  %s158_s26 = int_to_ptr.vmem [resolvable:$true] %s157_s26 }
  0x12   : > { %s2813_s24 = scalar_select %p2475_p8, 1, 0 }
  0x13   : > { %p2037_p9 = pneg %p2475_p8  ;;  %s2245_s4 = scalar_lea.hbm %s2802_s1, 7168 }
  0x14   : > { %p2246_p12 = scmp.ne.s32.totalorder %s2802_s1, %s2245_s4  ;;  %p2252_p5 = scmp.lt.u32.totalorder %s2245_s4, %s2802_s1 }
  0x15   : > { %p2484_p11 = pnand %p2037_p9, %p2455_p1 }
  0x17   : > { %p2247_p13 = pneg %p2484_p11 }
  0x19   : > { %p2248_p0 = pnand %p2247_p13, %p2246_p12 }
  0x1b   : > { %p2249_p3 = pneg %p2248_p0 }
  0x1d   : > { %p2254_p7 = pnand %p2252_p5, %p2249_p3 }
  0x1f   : > { %2257 = shalt.err (!%p2254_p7)
}
  0x20   : > { %s2258_s9 = scalar_lea.vmem %s158_s26, 7168  ;;  %p2266_p1 = scmp.lt.s32.totalorder %s158_s26, %s158_s26 }
  0x21   : > { %p2259_p9 = scmp.ne.s32.totalorder %s158_s26, %s2258_s9  ;;  %p2267_p4 = scmp.lt.s32.totalorder %s2258_s9, %s2258_s9 }
  0x23   : > { %p2261_p10 = pnand %p2259_p9, %p2247_p13  ;;  %p2268_p8 = por %p2267_p4, %p2266_p1 }
  0x25   : > { %p2262_p6 = pneg %p2261_p10 }
  0x27   : > { %p2269_p2 = pnand %p2268_p8, %p2262_p6 }
  0x29   : > { %2272 = shalt.err (!%p2269_p2)
}
  0x2a   : > { %s2392_s10 = smov 64   ;;  %s2393_s11 = smov 4  }
  0x2b   : > { %2040 = dma.hbm_to_vmem [thread:$0]  (!%p2484_p11), %s2802_s1, 7168, %s158_s26, [#allocation6], %s2392_s10, %s2392_s10, %s2393_s11  }
  0x2c   : > { %p34_p1 = scmp.ge.s32.totalorder %s32_s28, 2  ;;  %s39_s25 = sadd.s32 1, %s2377_s14 }
  0x2d   : > { %p46_p2 = scmp.ne.s32.totalorder %s2377_s14, %s2373_s13  ;;  %p47_p4 = scmp.eq.s32.totalorder %s2389_s17, 0 }
  0x2e   : > { %s2829_s28 = smov (%p34_p1, %s32_s28), 0  ;;  %p2815_p8 = scmp.ne.s32.totalorder %s2810_s21, 0 }
  0x2f   : > { %p48_p6 = por %p47_p4, %p46_p2  ;;  %s36_s30 = ssub.s32 %s2385_s16, %s2829_s28 }
  0x30   : > { %p2513_p10 = por %p2815_p8, %p46_p2  ;;  %p2050_p12 = scmp.lt.s32.totalorder %s2389_s17, 2 }
  0x31   : > { %p37_p13 = scmp.eq.s32.totalorder %s36_s30, 0  ;;  %s177_s27 = sand.u32 1, %s2377_s14  }
  0x32   : > { %s2026_s4 = smul.u32 448, %s177_s27  ;;  %p2525_p11 = pnand %p2050_p12, %p48_p6 }
  0x33   : > { %s2522_s5 = scalar_select %p37_p13, %s2377_s14, %s39_s25  }
  0x34   : > { %s2027_s26 = smul.u32 7168, %s2385_s16  ;;  %s181_s6 = scalar_lea.vmem [#allocation2], %s2026_s4 }
  0x35   : > { %s189_s7 = sshll.u32 %s181_s6, 4  ;;  %s2536_s11 = scalar_lea.sflag [#allocation3], %s177_s27  ;;  %s2534_s7 = int_to_ptr.vmem [resolvable:$true] %s189_s7 }
  0x36   : > { %s2532_s10 = scalar_lea.hbm %s2801_s0, %s2027_s26  ;;  %p2275_p3 = pneg %p2525_p11 }
  0x37   : > { %s2273_s18 = scalar_lea.hbm %s2532_s10, 7168  ;;  %s2278_s30 = scalar_lea.hbm %s2801_s0, 14336 }
  0x38   : > { %p2274_p0 = scmp.ne.s32.totalorder %s2532_s10, %s2273_s18  ;;  %p2279_p9 = scmp.lt.u32.totalorder %s2532_s10, %s2801_s0 }
  0x39   : > { %p2280_p1 = scmp.lt.u32.totalorder %s2278_s30, %s2273_s18  ;;  %p2282_p4 = scmp.lt.u32.totalorder %s2273_s18, %s2532_s10 }
  0x3a   : > { %p2276_p5 = pnand %p2275_p3, %p2274_p0 }
  0x3b   : > { %p2281_p2 = por %p2280_p1, %p2279_p9 }
  0x3c   : > { %p2277_p7 = pneg %p2276_p5 }
  0x3d   : > { %p2283_p6 = por %p2282_p4, %p2281_p2 }
  0x3f   : > { %p2284_p8 = pnand %p2283_p6, %p2277_p7 }
  0x41   : > { %2287 = shalt.err (!%p2284_p8)
}
  0x42   : > { %s2288_s27 = scalar_lea.vmem %s2534_s7, 7168  ;;  %s2394_s6 = smov [#allocation2]  }
  0x43   : > { %p2289_p12 = scmp.ne.s32.totalorder %s2534_s7, %s2288_s27  ;;  %s2293_s9 = sshll.u32 %s2394_s6, 4  ;;  %s2294_s9 = int_to_ptr.vmem [resolvable:$false] %s2293_s9 }
  0x44   : > { %s2295_s21 = scalar_lea.vmem %s2294_s9, 14336  ;;  %p2296_p5 = scmp.lt.s32.totalorder %s2534_s7, %s2294_s9 }
  0x45   : > { %p2291_p13 = pnand %p2289_p12, %p2275_p3  ;;  %p2297_p9 = scmp.lt.s32.totalorder %s2295_s21, %s2288_s27 }
  0x47   : > { %p2292_p0 = pneg %p2291_p13  ;;  %p2298_p1 = por %p2297_p9, %p2296_p5 }
  0x49   : > { %p2299_p2 = pnand %p2298_p1, %p2292_p0 }
  0x4b   : > { %2302 = shalt.err (!%p2299_p2)
}
  0x4c   : > { %s2395_s18 = smov 448   ;;  %s2396_s19 = smov 28  }
  0x4d   : > { %2044 = dma.hbm_to_vmem [thread:$0]  (!%p2525_p11), %s2532_s10, 7168, %s2534_s7, %s2536_s11, %s2395_s18, %s2395_s18, %s2396_s19  }
  0x4e   : > { %p2818_p3 = scmp.ne.s32.totalorder %s2813_s24, 0 }
  0x4f   : > { %s2567_s25 = sand.u32 (!%p2818_p3), 1, %s2373_s13   ;;  %p2819_p7 = scmp.ne.s32.totalorder (!%p2818_p3), %s2811_s22, 0 }
  0x50   : > { %201 = sbr.rel (%p2818_p3) target bundleno = 483 (0x1e3), region = 32  ;;  %s204_s4 = scalar_lea.sflag (!%p2818_p3), [#allocation3], %s2567_s25 }
  0x51   : > { %s2028_s30 = smul.u32 (!%p2818_p3), 448, %s2567_s25 }
  0x53   : > { %s2571_s26 = scalar_lea.vmem (!%p2818_p3), [#allocation2], %s2028_s30 }
  0x57   : > { %2356 = dma.done.wait (%p2819_p7), %s204_s4, 7168  }
  0x58   : > { %2358 = vsyncadd (%p2819_p7), %s204_s4, 4294960128  ;;  %p2820_p11 = scmp.ne.s32.totalorder %s2809_s20, 0 }
  0x5a   : > { %2360 = dma.done.wait (%p2820_p11), [#allocation6], 7168  }
  0x5b   : > { %2362 = vsyncadd (%p2820_p11), [#allocation6], 4294960128  ;;  %v2109_v0 = vld [vmem:[#allocation5 + $0x40] sm:$0xff]   ;;  %v2113_v4 = vld [vmem:[#allocation5 + $0x48] sm:$0xff]   ;;  %vm1066_vm0 = vcmask 1044480   ;;  %vm1067_vm1 = vcmask 1045504  }
  0x5c   : > { %v2110_v1 = vld [vmem:[#allocation5] sm:$0xff]   ;;  %1786 = vmatprep.subr.bf16.mxu0 %v2109_v0  ;;  %v2114_v5 = vld [vmem:[#allocation5 + $0x8] sm:$0xff]   ;;  %v2117_v8 = vld [vmem:[#allocation5 + $0x50] sm:$0xff]   ;;  %vm1041_vm2 = vcmask 1006592   ;;  %s1658_s24 = sshll.u32 %s2567_s25, 7  ;;  %s1785_s8 = sshll.u32 %s2381_s15, 11 }
  0x5d   : > { %v2111_v2 = vld [vmem:[#allocation5 + $0xc0] sm:$0xff]   ;;  %1787 = vmatpush3.bf16.msra.mxu0 %v2110_v1  ;;  %v2115_v6 = vld [vmem:[#allocation5 + $0xc8] sm:$0xff]   ;;  %v2118_v9 = vld [vmem:[#allocation5 + $0x10] sm:$0xff]   ;;  %s2701_s7 = scalar_lea.vmem [#allocation7], %s1658_s24  ;;  %s2748_s6 = scalar_lea.hbm %s2804_s3, %s1785_s8 }
  0x5e   : > { %v2112_v3 = vld [vmem:[#allocation5 + $0x80] sm:$0xff]   ;;  %1850 = vmatprep.subr.bf16.mxu1 %v2111_v2  ;;  %1788 = vmatprep.subr.bf16.mxu0 %v2113_v4  ;;  %v2116_v7 = vld [vmem:[#allocation5 + $0x88] sm:$0xff]   ;;  %v2119_v10 = vld [vmem:[#allocation5 + $0xd0] sm:$0xff]   ;;  %s1540_s10 = sshll.u32 %s2701_s7, 4  ;;  %s1526_s15 = scalar_lea.sflag [#allocation4], %s2567_s25  ;;  %s2750_s10 = int_to_ptr.vmem [resolvable:$true] %s1540_s10 }
  0x5f   : > { %1851 = vmatpush3.bf16.msra.mxu1 %v2112_v3  ;;  %v2120_v11 = vld [vmem:[#allocation5 + $0x90] sm:$0xff]   ;;  %v2121_v12 = vld [vmem:[#allocation5 + $0x58] sm:$0xff]   ;;  %v2125_v16 = vld [vmem:[#allocation5 + $0x60] sm:$0xff]   ;;  %s2303_s9 = scalar_lea.vmem %s2750_s10, 2048  ;;  %s2398_s21 = smov [#allocation7]  }
  0x60   : > { %1852 = vmatprep.subr.bf16.mxu1 %v2115_v6  ;;  %v2122_v13 = vld [vmem:[#allocation5 + $0x18] sm:$0xff]   ;;  %v2126_v17 = vld [vmem:[#allocation5 + $0x20] sm:$0xff]   ;;  %v2129_v20 = vld [vmem:[#allocation5 + $0x68] sm:$0xff]   ;;  %p2304_p4 = scmp.ne.s32.totalorder %s2750_s10, %s2303_s9  ;;  %s2307_s18 = sshll.u32 %s2398_s21, 4  ;;  %s2308_s18 = int_to_ptr.vmem [resolvable:$false] %s2307_s18 }
  0x61   : > { %1789 = vmatpush3.bf16.msra.mxu0 %v2114_v5  ;;  %v2123_v14 = vld [vmem:[#allocation5 + $0xd8] sm:$0xff]   ;;  %v2127_v18 = vld [vmem:[#allocation5 + $0xe0] sm:$0xff]   ;;  %v2130_v21 = vld [vmem:[#allocation5 + $0x28] sm:$0xff]   ;;  %s2309_s19 = scalar_lea.vmem %s2308_s18, 4096  ;;  %p2310_p12 = scmp.lt.s32.totalorder %s2750_s10, %s2308_s18 }
  0x62   : > { %1790 = vmatprep.subr.bf16.mxu0 %v2117_v8  ;;  %v2124_v15 = vld [vmem:[#allocation5 + $0x98] sm:$0xff]   ;;  %v2128_v19 = vld [vmem:[#allocation5 + $0xa0] sm:$0xff]   ;;  %v2131_v22 = vld [vmem:[#allocation5 + $0xe8] sm:$0xff]   ;;  %p2305_p6 = pnand %p2304_p4, %p2513_p10  ;;  %p2311_p13 = scmp.lt.s32.totalorder %s2309_s19, %s2303_s9 }
  0x63   : > { %1853 = vmatpush3.bf16.msra.mxu1 %v2116_v7  ;;  %v2132_v23 = vld [vmem:[#allocation5 + $0xa8] sm:$0xff]   ;;  %v2133_v24 = vld [vmem:[#allocation5 + $0x70] sm:$0xff]   ;;  %v2137_v28 = vld [vmem:[#allocation5 + $0x78] sm:$0xff]  }
  0x64   : > { %1854 = vmatprep.subr.bf16.mxu1 %v2119_v10  ;;  %v2134_v25 = vld [vmem:[#allocation5 + $0x30] sm:$0xff]   ;;  %v2138_v29 = vld [vmem:[#allocation5 + $0x38] sm:$0xff]   ;;  %v2142_v32 = vld [vmem:[%s2571_s26 + $0x4] ss:$28 sps:$4 sm:$0xff]   ;;  %p2306_p8 = pneg %p2305_p6  ;;  %p2312_p0 = por %p2311_p13, %p2310_p12 }
  0x65   : > { %1791 = vmatpush3.bf16.msra.mxu0 %v2118_v9  ;;  %v2135_v26 = vld [vmem:[#allocation5 + $0xf0] sm:$0xff]   ;;  %v2139_v30 = vld [vmem:[#allocation5 + $0xf8] sm:$0xff]   ;;  %1105 = vmatprep.mubr.bf16.mxu0 %v2142_v32  ;;  %v2144_v34 = vld [vmem:[#allocation5 + $0x140] sm:$0xff]  }
  0x66   : > { %1792 = vmatprep.subr.bf16.mxu0 %v2121_v12  ;;  %v2136_v27 = vld [vmem:[#allocation5 + $0xb0] sm:$0xff]   ;;  %v2140_v31 = vld [vmem:[%s2571_s26] ss:$28 sps:$4 sm:$0xff]   ;;  %v2145_v35 = vld [vmem:[%s2571_s26 + $0x8] ss:$28 sps:$4 sm:$0xff]   ;;  %p2313_p5 = pnand %p2312_p0, %p2306_p8 }
  0x67   : > { %1855 = vmatpush3.bf16.msra.mxu1 %v2120_v11  ;;  %v2143_v33 = vld [vmem:[#allocation5 + $0xb8] sm:$0xff]   ;;  %v2147_v36 = vld [vmem:[%s2571_s26 + $0xc] ss:$28 sps:$4 sm:$0xff]   ;;  %v2148_v37 = vld [vmem:[#allocation5 + $0x100] sm:$0xff]  }
  0x68   : > { %1856 = vmatprep.subr.bf16.mxu1 %v2123_v14  ;;  %1202 = vmatprep.mubr.bf16.mxu1 %v2147_v36  ;;  %v2149_v38 = vld [vmem:[%s2571_s26 + $0x3c] ss:$28 sps:$4 sm:$0xff]   ;;  %v2152_v40 = vld [vmem:[#allocation5 + $0x148] sm:$0xff]   ;;  %v2153_v41 = vld [vmem:[%s2571_s26 + $0x44] ss:$28 sps:$4 sm:$0xff]  }
  0x69   : > { %1793 = vmatpush3.bf16.msra.mxu0 %v2122_v13  ;;  %v2151_v39 = vld [vmem:[%s2571_s26 + $0x38] ss:$28 sps:$4 sm:$0xff]   ;;  %v2155_v42 = vld [vmem:[#allocation5 + $0x108] sm:$0xff]   ;;  %v2156_v43 = vld [vmem:[%s2571_s26 + $0x40] ss:$28 sps:$4 sm:$0xff]  }
  0x6a   : > { %1794 = vmatprep.subr.bf16.mxu0 %v2125_v16  ;;  %v2157_v44 = vld [vmem:[%s2571_s26 + $0x74] ss:$28 sps:$4 sm:$0xff]   ;;  %v2161_v46 = vld [vmem:[%s2571_s26 + $0x7c] ss:$28 sps:$4 sm:$0xff]   ;;  %v2165_v49 = vld [vmem:[%s2571_s26 + $0xac] ss:$28 sps:$4 sm:$0xff]  }
  0x6b   : > { %1857 = vmatpush3.bf16.msra.mxu1 %v2124_v15  ;;  %v2160_v45 = vld [vmem:[#allocation5 + $0x150] sm:$0xff]   ;;  %v2168_v50 = vld [vmem:[#allocation5 + $0x158] sm:$0xff]   ;;  %v2176_v54 = vld [vmem:[#allocation5 + $0x160] sm:$0xff]   ;;  %v2397_v15 = vmov 65535  }
  0x6c   : > { %1858 = vmatprep.subr.bf16.mxu1 %v2127_v18  ;;  %v2163_v47 = vld [vmem:[#allocation5 + $0x110] sm:$0xff]   ;;  %v2171_v52 = vld [vmem:[#allocation5 + $0x118] sm:$0xff]   ;;  %v2167_v55 = vld [vmem:[%s2571_s26 + $0xa8] ss:$28 sps:$4 sm:$0xff]   ;;  %v1068_v16 = vsel %vm1066_vm0, 4294967295, %v2397_v15 }
  0x6d   : > { %1795 = vmatpush3.bf16.msra.mxu0 %v2126_v17  ;;  %v2159_v48 = vld [vmem:[%s2571_s26 + $0x70] ss:$28 sps:$4 sm:$0xff]   ;;  %v2164_v51 = vld [vmem:[%s2571_s26 + $0x78] ss:$28 sps:$4 sm:$0xff]   ;;  %v2179_v56 = vld [vmem:[#allocation5 + $0x120] sm:$0xff]  }
  0x6e   : > { %1796 = vmatprep.subr.bf16.mxu0 %v2129_v20  ;;  %v2169_v53 = vld [vmem:[%s2571_s26 + $0xb4] ss:$28 sps:$4 sm:$0xff]   ;;  %v2173_v57 = vld [vmem:[%s2571_s26 + $0xe4] ss:$28 sps:$4 sm:$0xff]   ;;  %v2177_v60 = vld [vmem:[%s2571_s26 + $0xec] ss:$28 sps:$4 sm:$0xff]  }
  0x6f   : > { %1859 = vmatpush3.bf16.msra.mxu1 %v2128_v19  ;;  %v2181_v58 = vld [vmem:[#allocation5 + $0x180] sm:$0xff]   ;;  %v2172_v59 = vld [vmem:[%s2571_s26 + $0xb0] ss:$28 sps:$4 sm:$0xff]   ;;  %v2182_v3 = vld [vmem:[%s2571_s26 + $0x11c] ss:$28 sps:$4 sm:$0xff]   ;;  %v1069_v19 = vsel %vm1067_vm1, %v1068_v16, 0 }
  0x70   : > { %1860 = vmatprep.subr.bf16.mxu1 %v2131_v22  ;;  %v2185_v61 = vld [vmem:[#allocation5 + $0x168] sm:$0xff]   ;;  %v2191_v0 = vld [vmem:[#allocation5 + $0x190] sm:$0xff]   ;;  %v2175_v1 = vld [vmem:[%s2571_s26 + $0xe0] ss:$28 sps:$4 sm:$0xff]  }
  0x71   : > { %1797 = vmatpush3.bf16.msra.mxu0 %v2130_v21  ;;  %v2186_v62 = vld [vmem:[#allocation5 + $0x188] sm:$0xff]   ;;  %v2195_v4 = vld [vmem:[#allocation5 + $0x170] sm:$0xff]   ;;  %v2196_v5 = vld [vmem:[#allocation5 + $0x198] sm:$0xff]  }
  0x72   : > { %1798 = vmatprep.subr.bf16.mxu0 %v2133_v24  ;;  %v2189_v63 = vld [vmem:[#allocation5 + $0x128] sm:$0xff]   ;;  %v2187_v6 = vld [vmem:[%s2571_s26 + $0x124] ss:$28 sps:$4 sm:$0xff]   ;;  %v2199_v7 = vld [vmem:[#allocation5 + $0x130] sm:$0xff]  }
  0x73   : > { %1861 = vmatpush3.bf16.msra.mxu1 %v2132_v23  ;;  %v2180_v2 = vld [vmem:[%s2571_s26 + $0xe8] ss:$28 sps:$4 sm:$0xff]   ;;  %v2184_v9 = vld [vmem:[%s2571_s26 + $0x118] ss:$28 sps:$4 sm:$0xff]   ;;  %v2190_v11 = vld [vmem:[%s2571_s26 + $0x120] ss:$28 sps:$4 sm:$0xff]  }
  0x74   : > { %1862 = vmatprep.subr.bf16.mxu1 %v2135_v26  ;;  %v2201_v8 = vld [vmem:[#allocation5 + $0x1a0] sm:$0xff]   ;;  %v2205_v10 = vld [vmem:[#allocation5 + $0x178] sm:$0xff]   ;;  %v2192_v12 = vld [vmem:[%s2571_s26 + $0x154] ss:$28 sps:$4 sm:$0xff]  }
  0x75   : > { %1799 = vmatpush3.bf16.msra.mxu0 %v2134_v25  ;;  %v2206_v13 = vld [vmem:[#allocation5 + $0x1a8] sm:$0xff]   ;;  %v2209_v14 = vld [vmem:[#allocation5 + $0x138] sm:$0xff]   ;;  %v2211_v18 = vld [vmem:[#allocation5 + $0x1b0] sm:$0xff]  }
  0x76   : > { %1800 = vmatprep.subr.bf16.mxu0 %v2137_v28  ;;  %v2197_v17 = vld [vmem:[%s2571_s26 + $0x15c] ss:$28 sps:$4 sm:$0xff]   ;;  %v2194_v21 = vld [vmem:[%s2571_s26 + $0x150] ss:$28 sps:$4 sm:$0xff]   ;;  %v2204_v26 = vld [vmem:[%s2571_s26 + $0x188] ss:$28 sps:$4 sm:$0xff]  }
  0x77   : > { %1863 = vmatpush3.bf16.msra.mxu1 %v2136_v27  ;;  %v2215_v20 = vld [vmem:[#allocation5 + $0x1b8] sm:$0x3f]   ;;  %v2202_v22 = vld [vmem:[%s2571_s26 + $0x18c] ss:$28 sps:$4 sm:$0xff]   ;;  %v2207_v25 = vld [vmem:[%s2571_s26 + $0x194] ss:$28 sps:$4 sm:$0xff]  }
  0x78   : > { %1864 = vmatprep.subr.bf16.mxu1 %v2139_v30  ;;  %v1071_v23 = vand.u32 %v2215_v20, %v1069_v19  ;;  %v2200_v24 = vld [vmem:[%s2571_s26 + $0x158] ss:$28 sps:$4 sm:$0xff]   ;;  %v2210_v28 = vld [vmem:[%s2571_s26 + $0x190] ss:$28 sps:$4 sm:$0xff]   ;;  %v2225_v36 = vld [vmem:[%s2571_s26 + $0xc0] ss:$28 sps:$4 sm:$0xff]  }
  0x79   : > { %1801 = vmatpush3.bf16.msra.mxu0 %v2138_v29  ;;  %v2214_v27 = vld [vmem:[%s2571_s26 + $0x14] ss:$28 sps:$4 sm:$0xff]  }
  0x7a   : > { %1914 = vmatprep.subr.bf16.mxu0 %v2144_v34  ;;  %v2216_v29 = vld [vmem:[%s2571_s26 + $0x18] ss:$28 sps:$4 sm:$0xff]   ;;  %v2212_v30 = vld [vmem:[%s2571_s26 + $0x10] ss:$28 sps:$4 sm:$0xff]   ;;  %v2220_v34 = vld [vmem:[%s2571_s26 + $0x48] ss:$28 sps:$4 sm:$0xff]  }
  0x7b   : > { %1865 = vmatpush3.bf16.msra.mxu1 %v2143_v33  ;;  %v2217_v32 = vld [vmem:[%s2571_s26 + $0x50] ss:$28 sps:$4 sm:$0xff]   ;;  %v2224_v33 = vld [vmem:[%s2571_s26 + $0x88] ss:$28 sps:$4 sm:$0xff]  }
  0x7c   : > { %1106 = vmatmul.mubr.bf16.vlgmr.msra.gmra.mrb[0].mxu0 %v2140_v31  ;;  %1994 = vmatprep.subr.bf16.mxu1 %v2181_v58  ;;  %v2218_v31 = vld [vmem:[%s2571_s26 + $0x4c] ss:$28 sps:$4 sm:$0xff]  }
  0x7d   : > { %1915 = vmatpush3.bf16.msra.mxu0 %v2148_v37  ;;  %1113 = vmatprep.mubr.bf16.mxu0 %v2149_v38  ;;  %v2232_v37 = vld [vmem:[%s2571_s26 + $0xf8] ss:$28 sps:$4 sm:$0xff]   ;;  %v2223_v38 = vld [vmem:[%s2571_s26 + $0x80] ss:$28 sps:$4 sm:$0xff]  }
  0x7e   : > { %1203 = vmatmul.mubr.bf16.vlgmr.msra.gmra.mrb[0].mxu1 %v2145_v35  ;;  %1916 = vmatprep.subr.bf16.mxu0 %v2152_v40  ;;  %v2221_v35 = vld [vmem:[%s2571_s26 + $0x84] ss:$28 sps:$4 sm:$0xff]   ;;  %v2233_v40 = vld [vmem:[%s2571_s26 + $0x130] ss:$28 sps:$4 sm:$0xff]  }
  0x7f   : > { %1210 = vmatprep.mubr.bf16.mxu1 %v2153_v41  ;;  %1995 = vmatpush3.bf16.msra.mxu1 %v2181_v58  ;;  %v2240_v41 = vld [vmem:[%s2571_s26 + $0x168] ss:$28 sps:$4 sm:$0xff]  }
  0x80   : > { %1996 = vmatprep.subr.bf16.mxu1 %v2186_v62 }
  0x81   : > { %1917 = vmatpush3.bf16.msra.mxu0 %v2155_v42  ;;  %v2228_v42 = vld [vmem:[%s2571_s26 + $0xb8] ss:$28 sps:$4 sm:$0xff]  }
  0x82   : > { %1918 = vmatprep.subr.bf16.mxu0 %v2160_v45  ;;  %v2231_v45 = vld [vmem:[%s2571_s26 + $0xf0] ss:$28 sps:$4 sm:$0xff]  }
  0x83   : > { %1997 = vmatpush3.bf16.msra.mxu1 %v2186_v62 }
  0x84   : > { %1114 = vmatmul.mubr.bf16.gmra.mrb[4].mxu0 %v2151_v39  ;;  %1998 = vmatprep.subr.bf16.mxu1 %v2191_v0  ;;  %v2226_v39 = vld [vmem:[%s2571_s26 + $0xbc] ss:$28 sps:$4 sm:$0xff]  }
  0x85   : > { %1121 = vmatprep.mubr.bf16.mxu0 %v2157_v44  ;;  %1919 = vmatpush3.bf16.msra.mxu0 %v2163_v47  ;;  %v2241_v44 = vld [vmem:[%s2571_s26 + $0x1a0] ss:$28 sps:$4 sm:$0xff]   ;;  %v2236_v47 = vld [vmem:[%s2571_s26 + $0x128] ss:$28 sps:$4 sm:$0xff]  }
  0x86   : > { %1211 = vmatmul.mubr.bf16.gmra.mrb[4].mxu1 %v2156_v43  ;;  %1920 = vmatprep.subr.bf16.mxu0 %v2168_v50  ;;  %v2229_v43 = vld [vmem:[%s2571_s26 + $0xf4] ss:$28 sps:$4 sm:$0xff]   ;;  %v2242_v50 = vld [vmem:[%s2571_s26 + $0x19c] ss:$28 sps:$4 sm:$0xff]  }
  0x87   : > { %1218 = vmatprep.mubr.bf16.mxu1 %v2161_v46  ;;  %1999 = vmatpush3.bf16.msra.mxu1 %v2191_v0  ;;  %v2234_v46 = vld [vmem:[%s2571_s26 + $0x12c] ss:$28 sps:$4 sm:$0xff]  }
  0x88   : > { %2000 = vmatprep.subr.bf16.mxu1 %v2196_v5 }
  0x89   : > { %1921 = vmatpush3.bf16.msra.mxu0 %v2171_v52 }
  0x8a   : > { %1922 = vmatprep.subr.bf16.mxu0 %v2176_v54 }
  0x8b   : > { %2001 = vmatpush3.bf16.msra.mxu1 %v2196_v5 }
  0x8c   : > { %1122 = vmatmul.mubr.bf16.gmra.mrb[8].mxu0 %v2159_v48  ;;  %2002 = vmatprep.subr.bf16.mxu1 %v2201_v8  ;;  %v2237_v48 = vld [vmem:[%s2571_s26 + $0x164] ss:$28 sps:$4 sm:$0xff]  }
  0x8d   : > { %1129 = vmatprep.mubr.bf16.mxu0 %v2165_v49  ;;  %1923 = vmatpush3.bf16.msra.mxu0 %v2179_v56  ;;  %v2239_v49 = vld [vmem:[%s2571_s26 + $0x160] ss:$28 sps:$4 sm:$0xff]  }
  0x8e   : > { %1219 = vmatmul.mubr.bf16.gmra.mrb[8].mxu1 %v2164_v51  ;;  %1924 = vmatprep.subr.bf16.mxu0 %v2185_v61  ;;  %v2244_v51 = vld [vmem:[%s2571_s26 + $0x198] ss:$28 sps:$4 sm:$0xff]  }
  0x8f   : > { %1226 = vmatprep.mubr.bf16.mxu1 %v2169_v53  ;;  %2003 = vmatpush3.bf16.msra.mxu1 %v2201_v8  ;;  %v2648_v53 = vld [vmem:[%s2803_s2] ss:$0 sm:$0xff] }
  0x90   : > { %2004 = vmatprep.subr.bf16.mxu1 %v2206_v13 }
  0x91   : > { %1925 = vmatpush3.bf16.msra.mxu0 %v2189_v63 }
  0x92   : > { %1926 = vmatprep.subr.bf16.mxu0 %v2195_v4 }
  0x93   : > { %2005 = vmatpush3.bf16.msra.mxu1 %v2206_v13 }
  0x94   : > { %1130 = vmatmul.mubr.bf16.gmra.mrb[12].mxu0 %v2167_v55  ;;  %2006 = vmatprep.subr.bf16.mxu1 %v2211_v18 }
  0x95   : > { %1137 = vmatprep.mubr.bf16.mxu0 %v2173_v57  ;;  %1927 = vmatpush3.bf16.msra.mxu0 %v2199_v7 }
  0x96   : > { %1227 = vmatmul.mubr.bf16.gmra.mrb[12].mxu1 %v2172_v59  ;;  %1928 = vmatprep.subr.bf16.mxu0 %v2205_v10 }
  0x97   : > { %1234 = vmatprep.mubr.bf16.mxu1 %v2177_v60  ;;  %2007 = vmatpush3.bf16.msra.mxu1 %v2211_v18 }
  0x98   : > { %2008 = vmatprep.subr.bf16.mxu1 %v1071_v23 }
  0x99   : > { %1929 = vmatpush3.bf16.msra.mxu0 %v2209_v14 }
  0x9b   : > { %2009 = vmatpush3.bf16.msra.mxu1 %v1071_v23 }
  0x9c   : > { %1138 = vmatmul.mubr.bf16.gmra.mrb[16].mxu0 %v2175_v1 }
  0x9d   : > { %1145 = vmatprep.mubr.bf16.mxu0 %v2182_v3 }
  0x9e   : > { %1235 = vmatmul.mubr.bf16.gmra.mrb[16].mxu1 %v2180_v2 }
  0x9f   : > { %1242 = vmatprep.mubr.bf16.mxu1 %v2187_v6 }
  0xa4   : > { %1146 = vmatmul.mubr.bf16.gmra.mrb[20].mxu0 %v2184_v9 }
  0xa5   : > { %1153 = vmatprep.mubr.bf16.mxu0 %v2192_v12 }
  0xa6   : > { %1243 = vmatmul.mubr.bf16.gmra.mrb[20].mxu1 %v2190_v11 }
  0xa7   : > { %1250 = vmatprep.mubr.bf16.mxu1 %v2197_v17 }
  0xac   : > { %1154 = vmatmul.mubr.bf16.gmra.mrb[24].mxu0 %v2194_v21 }
  0xad   : > { %1161 = vmatprep.mubr.bf16.mxu0 %v2202_v22 }
  0xae   : > { %1251 = vmatmul.mubr.bf16.gmra.mrb[24].mxu1 %v2200_v24 }
  0xaf   : > { %1258 = vmatprep.mubr.bf16.mxu1 %v2207_v25 }
  0xb4   : > { %1162 = vmatmul.mubr.bf16.gmra.mrb[28].mxu0 %v2204_v26 }
  0xb5   : > { %1299 = vmatprep.mubr.bf16.mxu0 %v2214_v27 }
  0xb6   : > { %1259 = vmatmul.mubr.bf16.gmra.mrb[28].mxu1 %v2210_v28 }
  0xb7   : > { %2010 = vmatprep.mubr.msk.bf16.mxu1 %vm1041_vm2, %v2216_v29 }
  0xbc   : > { %1300 = vmatmul.mubr.bf16.vlgmr.msra.gmra.mrb[32].mxu0 %v2212_v30 }
  0xbd   : > { %1307 = vmatprep.mubr.bf16.mxu0 %v2218_v31 }
  0xbe   : > { %2011 = vmatmul.mubr.msk.bf16.vlgmr.msra.gmra.mrb[32].mxu1 %vm1041_vm2, %v2217_v32 }
  0xbf   : > { %2014 = vmatprep.mubr.msk.bf16.mxu1 %vm1041_vm2, %v2224_v33 }
  0xc4   : > { %1308 = vmatmul.mubr.bf16.gmra.mrb[36].mxu0 %v2220_v34 }
  0xc5   : > { %1315 = vmatprep.mubr.bf16.mxu0 %v2221_v35 }
  0xc6   : > { %2015 = vmatmul.mubr.msk.bf16.gmra.mrb[36].mxu1 %vm1041_vm2, %v2225_v36 }
  0xc7   : > { %2018 = vmatprep.mubr.msk.bf16.mxu1 %vm1041_vm2, %v2232_v37 }
  0xcc   : > { %1316 = vmatmul.mubr.bf16.gmra.mrb[40].mxu0 %v2223_v38 }
  0xcd   : > { %1323 = vmatprep.mubr.bf16.mxu0 %v2226_v39 }
  0xce   : > { %2019 = vmatmul.mubr.msk.bf16.gmra.mrb[40].mxu1 %vm1041_vm2, %v2233_v40 }
  0xcf   : > { %2022 = vmatprep.mubr.msk.bf16.mxu1 %vm1041_vm2, %v2240_v41 }
  0xd4   : > { %1324 = vmatmul.mubr.bf16.gmra.mrb[44].mxu0 %v2228_v42 }
  0xd5   : > { %1331 = vmatprep.mubr.bf16.mxu0 %v2229_v43 }
  0xd6   : > { %2023 = vmatmul.mubr.msk.bf16.gmra.mrb[44].mxu1 %vm1041_vm2, %v2241_v44 }
  0xdc   : > { %1332 = vmatmul.mubr.bf16.gmra.mrb[48].mxu0 %v2231_v45 }
  0xdd   : > { %1339 = vmatprep.mubr.bf16.mxu0 %v2234_v46 }
  0xe4   : > { %1340 = vmatmul.mubr.bf16.gmra.mrb[52].mxu0 %v2236_v47 }
  0xe5   : > { %1347 = vmatprep.mubr.bf16.mxu0 %v2237_v48 }
  0xec   : > { %1348 = vmatmul.mubr.bf16.gmra.mrb[56].mxu0 %v2239_v49 }
  0xed   : > { %1355 = vmatprep.mubr.bf16.mxu0 %v2242_v50 }
  0xf4   : > { %1356 = vmatmul.mubr.bf16.gmra.mrb[60].mxu0 %v2244_v51 }
 0x14f   : > { %v1802_v52 = vpop.f32.mrb[0].mxu0 }
 0x150   : > { %v1803_v54 = vpop.f32.mrb[1].mxu0 }
 0x151   : > { %v1804_v55 = vadd.f32 %v1803_v54, %v1802_v52  ;;  %v1805_v56 = vpop.f32.mrb[2].mxu0  ;;  %v1866_v57 = vpop.f32.mrb[0].mxu1 }
 0x152   : > { %v1806_v58 = vpop.f32.mrb[3].mxu0  ;;  %v1867_v61 = vpop.f32.mrb[1].mxu1 }
 0x153   : > { %v1108_v59 = vadd.f32 %v1804_v55, %v2648_v53  ;;  %v1807_v60 = vadd.f32 %v1806_v58, %v1805_v56  ;;  %v1868_v62 = vadd.f32 %v1867_v61, %v1866_v57  ;;  %v1869_v63 = vpop.f32.mrb[2].mxu1 }
 0x154   : > { %v1870_v1 = vpop.f32.mrb[3].mxu1 }
 0x155   : > { %v1111_v0 = vadd.f32 %v1807_v60, %v2648_v53  ;;  %v2652_v2 = vadd.f32 %v1868_v62, %v1108_v59  ;;  %v1871_v3 = vadd.f32 %v1870_v1, %v1869_v63 }
 0x157   : > { %v1808_v4 = vpop.f32.mrb[4].mxu0  ;;  %v2654_v5 = vadd.f32 %v1871_v3, %v1111_v0 }
 0x158   : > { %v1809_v6 = vpop.f32.mrb[5].mxu0 }
 0x159   : > { %v1810_v7 = vadd.f32 %v1809_v6, %v1808_v4  ;;  %v1811_v8 = vpop.f32.mrb[6].mxu0  ;;  %v1872_v9 = vpop.f32.mrb[4].mxu1 }
 0x15a   : > { %v1812_v10 = vpop.f32.mrb[7].mxu0  ;;  %v1873_v13 = vpop.f32.mrb[5].mxu1 }
 0x15b   : > { %v1116_v11 = vadd.f32 %v1810_v7, %v2648_v53  ;;  %v1813_v12 = vadd.f32 %v1812_v10, %v1811_v8  ;;  %v1874_v14 = vadd.f32 %v1873_v13, %v1872_v9  ;;  %v1875_v15 = vpop.f32.mrb[6].mxu1 }
 0x15c   : > { %v1876_v17 = vpop.f32.mrb[7].mxu1 }
 0x15d   : > { %v1119_v16 = vadd.f32 %v1813_v12, %v2648_v53  ;;  %v2658_v18 = vadd.f32 %v1874_v14, %v1116_v11  ;;  %v1877_v19 = vadd.f32 %v1876_v17, %v1875_v15 }
 0x15f   : > { %v1814_v20 = vpop.f32.mrb[8].mxu0  ;;  %v2660_v21 = vadd.f32 %v1877_v19, %v1119_v16 }
 0x160   : > { %v1815_v22 = vpop.f32.mrb[9].mxu0 }
 0x161   : > { %v1816_v23 = vadd.f32 %v1815_v22, %v1814_v20  ;;  %v1817_v24 = vpop.f32.mrb[10].mxu0  ;;  %v1878_v25 = vpop.f32.mrb[8].mxu1 }
 0x162   : > { %v1818_v26 = vpop.f32.mrb[11].mxu0  ;;  %v1879_v29 = vpop.f32.mrb[9].mxu1 }
 0x163   : > { %v1124_v27 = vadd.f32 %v1816_v23, %v2648_v53  ;;  %v1819_v28 = vadd.f32 %v1818_v26, %v1817_v24  ;;  %v1880_v30 = vadd.f32 %v1879_v29, %v1878_v25  ;;  %v1881_v31 = vpop.f32.mrb[10].mxu1 }
 0x164   : > { %v1882_v33 = vpop.f32.mrb[11].mxu1 }
 0x165   : > { %v1127_v32 = vadd.f32 %v1819_v28, %v2648_v53  ;;  %v2664_v34 = vadd.f32 %v1880_v30, %v1124_v27  ;;  %v1883_v35 = vadd.f32 %v1882_v33, %v1881_v31 }
 0x167   : > { %v1820_v36 = vpop.f32.mrb[12].mxu0  ;;  %v2666_v37 = vadd.f32 %v1883_v35, %v1127_v32 }
 0x168   : > { %v1821_v38 = vpop.f32.mrb[13].mxu0 }
 0x169   : > { %v1822_v39 = vadd.f32 %v1821_v38, %v1820_v36  ;;  %v1823_v40 = vpop.f32.mrb[14].mxu0  ;;  %v1884_v41 = vpop.f32.mrb[12].mxu1 }
 0x16a   : > { %v1824_v42 = vpop.f32.mrb[15].mxu0  ;;  %v1885_v45 = vpop.f32.mrb[13].mxu1 }
 0x16b   : > { %v1132_v43 = vadd.f32 %v1822_v39, %v2648_v53  ;;  %v1825_v44 = vadd.f32 %v1824_v42, %v1823_v40  ;;  %v1886_v46 = vadd.f32 %v1885_v45, %v1884_v41  ;;  %v1887_v47 = vpop.f32.mrb[14].mxu1 }
 0x16c   : > { %v1888_v49 = vpop.f32.mrb[15].mxu1 }
 0x16d   : > { %v1135_v48 = vadd.f32 %v1825_v44, %v2648_v53  ;;  %v2670_v50 = vadd.f32 %v1886_v46, %v1132_v43  ;;  %v1889_v51 = vadd.f32 %v1888_v49, %v1887_v47 }
 0x16f   : > { %v1826_v52 = vpop.f32.mrb[16].mxu0  ;;  %v2672_v54 = vadd.f32 %v1889_v51, %v1135_v48 }
 0x170   : > { %v1827_v55 = vpop.f32.mrb[17].mxu0 }
 0x171   : > { %v1828_v56 = vadd.f32 %v1827_v55, %v1826_v52  ;;  %v1829_v57 = vpop.f32.mrb[18].mxu0  ;;  %v1890_v58 = vpop.f32.mrb[16].mxu1 }
 0x172   : > { %v1830_v59 = vpop.f32.mrb[19].mxu0  ;;  %v1891_v62 = vpop.f32.mrb[17].mxu1 }
 0x173   : > { %v1140_v60 = vadd.f32 %v1828_v56, %v2648_v53  ;;  %v1831_v61 = vadd.f32 %v1830_v59, %v1829_v57  ;;  %v1892_v63 = vadd.f32 %v1891_v62, %v1890_v58  ;;  %v1893_v0 = vpop.f32.mrb[18].mxu1 }
 0x174   : > { %v1894_v3 = vpop.f32.mrb[19].mxu1 }
 0x175   : > { %v1143_v1 = vadd.f32 %v1831_v61, %v2648_v53  ;;  %v2676_v4 = vadd.f32 %v1892_v63, %v1140_v60  ;;  %v1895_v6 = vadd.f32 %v1894_v3, %v1893_v0 }
 0x177   : > { %v1832_v7 = vpop.f32.mrb[20].mxu0  ;;  %v2678_v8 = vadd.f32 %v1895_v6, %v1143_v1 }
 0x178   : > { %v1833_v9 = vpop.f32.mrb[21].mxu0 }
 0x179   : > { %v1834_v10 = vadd.f32 %v1833_v9, %v1832_v7  ;;  %v1835_v11 = vpop.f32.mrb[22].mxu0  ;;  %v1896_v12 = vpop.f32.mrb[20].mxu1 }
 0x17a   : > { %v1836_v13 = vpop.f32.mrb[23].mxu0  ;;  %v1897_v16 = vpop.f32.mrb[21].mxu1 }
 0x17b   : > { %v1148_v14 = vadd.f32 %v1834_v10, %v2648_v53  ;;  %v1837_v15 = vadd.f32 %v1836_v13, %v1835_v11  ;;  %v1898_v17 = vadd.f32 %v1897_v16, %v1896_v12  ;;  %v1899_v19 = vpop.f32.mrb[22].mxu1 }
 0x17c   : > { %v1900_v22 = vpop.f32.mrb[23].mxu1 }
 0x17d   : > { %v1151_v20 = vadd.f32 %v1837_v15, %v2648_v53  ;;  %v2682_v23 = vadd.f32 %v1898_v17, %v1148_v14  ;;  %v1901_v24 = vadd.f32 %v1900_v22, %v1899_v19 }
 0x17f   : > { %v1838_v25 = vpop.f32.mrb[24].mxu0  ;;  %v2684_v26 = vadd.f32 %v1901_v24, %v1151_v20 }
 0x180   : > { %v1839_v27 = vpop.f32.mrb[25].mxu0 }
 0x181   : > { %v1840_v28 = vadd.f32 %v1839_v27, %v1838_v25  ;;  %v1841_v29 = vpop.f32.mrb[26].mxu0  ;;  %v1902_v30 = vpop.f32.mrb[24].mxu1 }
 0x182   : > { %v1842_v31 = vpop.f32.mrb[27].mxu0  ;;  %v1903_v35 = vpop.f32.mrb[25].mxu1 }
 0x183   : > { %v1156_v32 = vadd.f32 %v1840_v28, %v2648_v53  ;;  %v1843_v33 = vadd.f32 %v1842_v31, %v1841_v29  ;;  %v1904_v36 = vadd.f32 %v1903_v35, %v1902_v30  ;;  %v1905_v38 = vpop.f32.mrb[26].mxu1 }
 0x184   : > { %v1906_v40 = vpop.f32.mrb[27].mxu1 }
 0x185   : > { %v1159_v39 = vadd.f32 %v1843_v33, %v2648_v53  ;;  %v2688_v41 = vadd.f32 %v1904_v36, %v1156_v32  ;;  %v1907_v42 = vadd.f32 %v1906_v40, %v1905_v38 }
 0x187   : > { %v1844_v43 = vpop.f32.mrb[28].mxu0  ;;  %v2690_v44 = vadd.f32 %v1907_v42, %v1159_v39 }
 0x188   : > { %v1845_v45 = vpop.f32.mrb[29].mxu0 }
 0x189   : > { %v1846_v46 = vadd.f32 %v1845_v45, %v1844_v43  ;;  %v1847_v47 = vpop.f32.mrb[30].mxu0  ;;  %v1908_v48 = vpop.f32.mrb[28].mxu1 }
 0x18a   : > { %v1848_v49 = vpop.f32.mrb[31].mxu0  ;;  %v1909_v55 = vpop.f32.mrb[29].mxu1 }
 0x18b   : > { %v1164_v51 = vadd.f32 %v1846_v46, %v2648_v53  ;;  %v1849_v52 = vadd.f32 %v1848_v49, %v1847_v47  ;;  %v1910_v56 = vadd.f32 %v1909_v55, %v1908_v48  ;;  %v1911_v57 = vpop.f32.mrb[30].mxu1 }
 0x18c   : > { %v1912_v59 = vpop.f32.mrb[31].mxu1 }
 0x18d   : > { %v1167_v58 = vadd.f32 %v1849_v52, %v2648_v53  ;;  %v2694_v60 = vadd.f32 %v1910_v56, %v1164_v51  ;;  %v1913_v61 = vadd.f32 %v1912_v59, %v1911_v57 }
 0x18f   : > { %v1930_v62 = vpop.f32.mrb[32].mxu0  ;;  %v2696_v63 = vadd.f32 %v1913_v61, %v1167_v58 }
 0x190   : > { %v1931_v0 = vpop.f32.mrb[33].mxu0 }
 0x191   : > { %v1932_v1 = vadd.f32 %v1931_v0, %v1930_v62  ;;  %v1933_v3 = vpop.f32.mrb[34].mxu0  ;;  %v2012_v7 = vpop.f32.mrb[32].mxu1 }
 0x192   : > { %v1934_v6 = vpop.f32.mrb[35].mxu0  ;;  %v1398_v11 = vpop.f32.mrb[33].mxu1 }
 0x193   : > { %v1935_v9 = vadd.f32 %v1934_v6, %v1933_v3  ;;  %v1302_v10 = vadd.f32 %v1932_v1, %v2652_v2  ;;  %v2013_v12 = vpop.f32.mrb[34].mxu1 }
 0x194   : > { %v1401_v14 = vpop.f32.mrb[35].mxu1 }
 0x195   : > { %v1399_v13 = vadd.f32 %v1398_v11, %v1302_v10  ;;  %v1305_v53 = vadd.f32 %v1935_v9, %v2654_v5 }
 0x197   : > { %vm1461_vm3 = vcmp.ge.f32.partialorder %v1399_v13, 0.0  ;;  %v1477_v15 = vmul.f32 0.1, %v1399_v13  ;;  %v1402_v16 = vadd.f32 %v1401_v14, %v1305_v53  ;;  %v1936_v17 = vpop.f32.mrb[36].mxu0 }
 0x198   : > { %v1937_v19 = vpop.f32.mrb[37].mxu0 }
 0x199   : > { %v1493_v20 = vsel %vm1461_vm3, %v1399_v13, %v1477_v15  ;;  %vm1462_vm4 = vcmp.ge.f32.partialorder %v1402_v16, 0.0  ;;  %v1478_v22 = vmul.f32 0.1, %v1402_v16  ;;  %v1938_v24 = vadd.f32 %v1937_v19, %v1936_v17  ;;  %v1939_v25 = vpop.f32.mrb[38].mxu0  ;;  %v2016_v27 = vpop.f32.mrb[36].mxu1 }
 0x19a   : > { %1509 = vst [vmem:[%s2701_s7] sm:$0xff] %v1493_v20  ;;  %v1940_v2 = vpop.f32.mrb[39].mxu0  ;;  %v1414_v30 = vpop.f32.mrb[37].mxu1 }
 0x19b   : > { %v1494_v28 = vsel %vm1462_vm4, %v1402_v16, %v1478_v22  ;;  %v1310_v5 = vadd.f32 %v1938_v24, %v2658_v18  ;;  %v1941_v29 = vadd.f32 %v1940_v2, %v1939_v25  ;;  %v2017_v31 = vpop.f32.mrb[38].mxu1 }
 0x19c   : > { %1510 = vst [vmem:[%s2701_s7 + $0x8] sm:$0xff] %v1494_v28  ;;  %v1417_v35 = vpop.f32.mrb[39].mxu1 }
 0x19d   : > { %v1407_v32 = vadd.f32 %v2012_v7, %v1310_v5  ;;  %v1313_v33 = vadd.f32 %v1941_v29, %v2660_v21 }
 0x19f   : > { %vm1463_vm5 = vcmp.ge.f32.partialorder %v1407_v32, 0.0  ;;  %v1479_v36 = vmul.f32 0.1, %v1407_v32  ;;  %v1410_v38 = vadd.f32 %v2013_v12, %v1313_v33  ;;  %v1942_v39 = vpop.f32.mrb[40].mxu0 }
 0x1a0   : > { %v1943_v40 = vpop.f32.mrb[41].mxu0 }
 0x1a1   : > { %v1495_v42 = vsel %vm1463_vm5, %v1407_v32, %v1479_v36  ;;  %vm1464_vm6 = vcmp.ge.f32.partialorder %v1410_v38, 0.0  ;;  %v1480_v43 = vmul.f32 0.1, %v1410_v38  ;;  %v1944_v45 = vadd.f32 %v1943_v40, %v1942_v39  ;;  %v1945_v18 = vpop.f32.mrb[42].mxu0  ;;  %v2708_v47 = vpop.f32.mrb[40].mxu1 }
 0x1a2   : > { %1511 = vst [vmem:[%s2701_s7 + $0x10] sm:$0xff] %v1495_v42  ;;  %v1946_v46 = vpop.f32.mrb[43].mxu0  ;;  %v1430_v51 = vpop.f32.mrb[41].mxu1 }
 0x1a3   : > { %v1496_v48 = vsel %vm1464_vm6, %v1410_v38, %v1480_v43  ;;  %v1947_v49 = vadd.f32 %v1946_v46, %v1945_v18  ;;  %v1318_v21 = vadd.f32 %v1944_v45, %v2664_v34  ;;  %v2712_v52 = vpop.f32.mrb[42].mxu1 }
 0x1a4   : > { %1512 = vst [vmem:[%s2701_s7 + $0x18] sm:$0xff] %v1496_v48  ;;  %v1433_v57 = vpop.f32.mrb[43].mxu1 }
 0x1a5   : > { %v1415_v55 = vadd.f32 %v1414_v30, %v1318_v21  ;;  %v1321_v56 = vadd.f32 %v1947_v49, %v2666_v37 }
 0x1a7   : > { %vm1465_vm7 = vcmp.ge.f32.partialorder %v1415_v55, 0.0  ;;  %v1481_v58 = vmul.f32 0.1, %v1415_v55  ;;  %v1418_v59 = vadd.f32 %v1417_v35, %v1321_v56  ;;  %v1948_v61 = vpop.f32.mrb[44].mxu0 }
 0x1a8   : > { %v1949_v62 = vpop.f32.mrb[45].mxu0 }
 0x1a9   : > { %v1497_v0 = vsel %vm1465_vm7, %v1415_v55, %v1481_v58  ;;  %vm1466_vm8 = vcmp.ge.f32.partialorder %v1418_v59, 0.0  ;;  %v1482_v1 = vmul.f32 0.1, %v1418_v59  ;;  %v1950_v3 = vadd.f32 %v1949_v62, %v1948_v61  ;;  %v1951_v34 = vpop.f32.mrb[46].mxu0  ;;  %v2716_v7 = vpop.f32.mrb[44].mxu1 }
 0x1aa   : > { %1513 = vst [vmem:[%s2701_s7 + $0x20] sm:$0xff] %v1497_v0  ;;  %v1952_v6 = vpop.f32.mrb[47].mxu0  ;;  %v1446_v11 = vpop.f32.mrb[45].mxu1 }
 0x1ab   : > { %v1498_v9 = vsel %vm1466_vm8, %v1418_v59, %v1482_v1  ;;  %v1326_v10 = vadd.f32 %v1950_v3, %v2670_v50  ;;  %v1953_v37 = vadd.f32 %v1952_v6, %v1951_v34  ;;  %v2720_v12 = vpop.f32.mrb[46].mxu1 }
 0x1ac   : > { %1514 = vst [vmem:[%s2701_s7 + $0x28] sm:$0xff] %v1498_v9  ;;  %v1449_v14 = vpop.f32.mrb[47].mxu1 }
 0x1ad   : > { %v1423_v13 = vadd.f32 %v2016_v27, %v1326_v10  ;;  %v1329_v53 = vadd.f32 %v1953_v37, %v2672_v54 }
 0x1af   : > { %vm1467_vm9 = vcmp.ge.f32.partialorder %v1423_v13, 0.0  ;;  %v1483_v15 = vmul.f32 0.1, %v1423_v13  ;;  %v1426_v16 = vadd.f32 %v2017_v31, %v1329_v53  ;;  %v1954_v17 = vpop.f32.mrb[48].mxu0 }
 0x1b0   : > { %v1955_v19 = vpop.f32.mrb[49].mxu0 }
 0x1b1   : > { %v1499_v20 = vsel %vm1467_vm9, %v1423_v13, %v1483_v15  ;;  %vm1468_vm10 = vcmp.ge.f32.partialorder %v1426_v16, 0.0  ;;  %v1484_v22 = vmul.f32 0.1, %v1426_v16  ;;  %v1956_v50 = vadd.f32 %v1955_v19, %v1954_v17  ;;  %v1957_v24 = vpop.f32.mrb[50].mxu0 }
 0x1b2   : > { %1515 = vst [vmem:[%s2701_s7 + $0x30] sm:$0xff] %v1499_v20  ;;  %v1958_v25 = vpop.f32.mrb[51].mxu0 }
 0x1b3   : > { %v1500_v2 = vsel %vm1468_vm10, %v1426_v16, %v1484_v22  ;;  %v1959_v28 = vadd.f32 %v1958_v25, %v1957_v24  ;;  %v1334_v27 = vadd.f32 %v1956_v50, %v2676_v4 }
 0x1b4   : > { %1516 = vst [vmem:[%s2701_s7 + $0x38] sm:$0xff] %v1500_v2 }
 0x1b5   : > { %v1431_v54 = vadd.f32 %v1430_v51, %v1334_v27  ;;  %v1337_v5 = vadd.f32 %v1959_v28, %v2678_v8 }
 0x1b7   : > { %vm1469_vm11 = vcmp.ge.f32.partialorder %v1431_v54, 0.0  ;;  %v1485_v29 = vmul.f32 0.1, %v1431_v54  ;;  %v1434_v30 = vadd.f32 %v1433_v57, %v1337_v5  ;;  %v1960_v31 = vpop.f32.mrb[52].mxu0 }
 0x1b8   : > { %v1961_v32 = vpop.f32.mrb[53].mxu0 }
 0x1b9   : > { %v1501_v33 = vsel %vm1469_vm11, %v1431_v54, %v1485_v29  ;;  %vm1470_vm12 = vcmp.ge.f32.partialorder %v1434_v30, 0.0  ;;  %v1486_v35 = vmul.f32 0.1, %v1434_v30  ;;  %v1962_v36 = vadd.f32 %v1961_v32, %v1960_v31  ;;  %v1963_v38 = vpop.f32.mrb[54].mxu0 }
 0x1ba   : > { %1517 = vst [vmem:[%s2701_s7 + $0x40] sm:$0xff] %v1501_v33  ;;  %v1964_v39 = vpop.f32.mrb[55].mxu0 }
 0x1bb   : > { %v1502_v40 = vsel %vm1470_vm12, %v1434_v30, %v1486_v35  ;;  %v1342_v4 = vadd.f32 %v1962_v36, %v2682_v23  ;;  %v1965_v42 = vadd.f32 %v1964_v39, %v1963_v38 }
 0x1bc   : > { %1518 = vst [vmem:[%s2701_s7 + $0x48] sm:$0xff] %v1502_v40 }
 0x1bd   : > { %v1439_v8 = vadd.f32 %v2708_v47, %v1342_v4  ;;  %v1345_v43 = vadd.f32 %v1965_v42, %v2684_v26 }
 0x1bf   : > { %vm1471_vm13 = vcmp.ge.f32.partialorder %v1439_v8, 0.0  ;;  %v1487_v45 = vmul.f32 0.1, %v1439_v8  ;;  %v1442_v18 = vadd.f32 %v2712_v52, %v1345_v43  ;;  %v1966_v46 = vpop.f32.mrb[56].mxu0 }
 0x1c0   : > { %v1967_v48 = vpop.f32.mrb[57].mxu0 }
 0x1c1   : > { %v1503_v49 = vsel %vm1471_vm13, %v1439_v8, %v1487_v45  ;;  %vm1472_vm14 = vcmp.ge.f32.partialorder %v1442_v18, 0.0  ;;  %v1488_v21 = vmul.f32 0.1, %v1442_v18  ;;  %v1968_v51 = vadd.f32 %v1967_v48, %v1966_v46  ;;  %v1969_v55 = vpop.f32.mrb[58].mxu0 }
 0x1c2   : > { %1519 = vst [vmem:[%s2701_s7 + $0x50] sm:$0xff] %v1503_v49  ;;  %v1970_v23 = vpop.f32.mrb[59].mxu0 }
 0x1c3   : > { %v1504_v56 = vsel %vm1472_vm14, %v1442_v18, %v1488_v21  ;;  %v1971_v57 = vadd.f32 %v1970_v23, %v1969_v55  ;;  %v1350_v47 = vadd.f32 %v1968_v51, %v2688_v41 }
 0x1c4   : > { %1520 = vst [vmem:[%s2701_s7 + $0x58] sm:$0xff] %v1504_v56 }
 0x1c5   : > { %v1447_v26 = vadd.f32 %v1446_v11, %v1350_v47  ;;  %v1353_v58 = vadd.f32 %v1971_v57, %v2690_v44 }
 0x1c7   : > { %vm1473_vm15 = vcmp.ge.f32.partialorder %v1447_v26, 0.0  ;;  %v1489_v52 = vmul.f32 0.1, %v1447_v26  ;;  %v1450_v59 = vadd.f32 %v1449_v14, %v1353_v58  ;;  %v1972_v61 = vpop.f32.mrb[60].mxu0 }
 0x1c8   : > { %v1973_v62 = vpop.f32.mrb[61].mxu0 }
 0x1c9   : > { %v1505_v0 = vsel %vm1473_vm15, %v1447_v26, %v1489_v52  ;;  %vm1474_vm0 = vcmp.ge.f32.partialorder %v1450_v59, 0.0  ;;  %v1490_v1 = vmul.f32 0.1, %v1450_v59  ;;  %v1974_v3 = vadd.f32 %v1973_v62, %v1972_v61  ;;  %v1975_v34 = vpop.f32.mrb[62].mxu0 }
 0x1ca   : > { %1521 = vst [vmem:[%s2701_s7 + $0x60] sm:$0xff] %v1505_v0  ;;  %v1976_v6 = vpop.f32.mrb[63].mxu0 }
 0x1cb   : > { %v1506_v41 = vsel %vm1474_vm0, %v1450_v59, %v1490_v1  ;;  %v1358_v9 = vadd.f32 %v1974_v3, %v2694_v60  ;;  %v1977_v44 = vadd.f32 %v1976_v6, %v1975_v34 }
 0x1cc   : > { %1522 = vst [vmem:[%s2701_s7 + $0x68] sm:$0xff] %v1506_v41 }
 0x1cd   : > { %v1455_v10 = vadd.f32 %v2716_v7, %v1358_v9  ;;  %v1361_v37 = vadd.f32 %v1977_v44, %v2696_v63 }
 0x1cf   : > { %vm1475_vm1 = vcmp.ge.f32.partialorder %v1455_v10, 0.0  ;;  %v1491_v11 = vmul.f32 0.1, %v1455_v10  ;;  %v1458_v13 = vadd.f32 %v2720_v12, %v1361_v37 }
 0x1d1   : > { %v1507_v53 = vsel %vm1475_vm1, %v1455_v10, %v1491_v11  ;;  %vm1476_vm2 = vcmp.ge.f32.partialorder %v1458_v13, 0.0  ;;  %v1492_v14 = vmul.f32 0.1, %v1458_v13 }
 0x1d2   : > { %1523 = vst [vmem:[%s2701_s7 + $0x70] sm:$0xff] %v1507_v53 }
 0x1d3   : > { %v1508_v60 = vsel %vm1476_vm2, %v1458_v13, %v1492_v14 }
 0x1d4   : > { %1524 = vst [vmem:[%s2701_s7 + $0x78] sm:$0xff] %v1508_v60 }
 0x1d5   : > { %2316 = shalt.err (!%p2313_p5)
}
 0x1d6   : > { %s2317_s30 = scalar_lea.hbm %s2748_s6, 2048  ;;  %s2321_s20 = scalar_lea.hbm %s2804_s3, 4096 }
 0x1d7   : > { %p2318_p9 = scmp.ne.s32.totalorder %s2748_s6, %s2317_s30  ;;  %p2322_p3 = scmp.lt.u32.totalorder %s2748_s6, %s2804_s3 }
 0x1d8   : > { %p2323_p7 = scmp.lt.u32.totalorder %s2321_s20, %s2317_s30  ;;  %p2325_p4 = scmp.lt.u32.totalorder %s2317_s30, %s2748_s6 }
 0x1d9   : > { %p2319_p1 = pnand %p2318_p9, %p2513_p10 }
 0x1da   : > { %p2324_p11 = por %p2323_p7, %p2322_p3 }
 0x1db   : > { %p2320_p2 = pneg %p2319_p1 }
 0x1dc   : > { %p2326_p6 = por %p2325_p4, %p2324_p11 }
 0x1de   : > { %p2327_p8 = pnand %p2326_p6, %p2320_p2 }
 0x1e0   : > { %2330 = shalt.err (!%p2327_p8)
}
 0x1e1   : > { %s2399_s7 = smov 128   ;;  %s2400_s8 = smov 8  }
 0x1e2   : > { %2035 = dma.vmem_to_hbm [thread:$0]  (%p2513_p10), %s2750_s10, 2048, %s2748_s6, %s1526_s15, %s2399_s7, %s2399_s7, %s2400_s8  }
 0x1e3 PF: > { %s1555_s11 = sand.u32 1, %s2369_s12   ;;  %p2821_p12 = scmp.ne.s32.totalorder %s2812_s23, 0 }
 0x1e4   : > { %p2822_p13 = scmp.ge.s32.totalorder %s2389_s17, 2  ;;  %s1556_s27 = scalar_lea.sflag [#allocation4], %s1555_s11 }
 0x1e6   : > { %p2046_p0 = pnand %p2822_p13, %p2821_p12 }
 0x1e8   : > { %2364 = dma.done.wait (!%p2046_p0), %s1556_s27, 2048  }
 0x1e9   : > { %2366 = vsyncadd (!%p2046_p0), %s1556_s27, 4294965248  ;;  %s20_s17 = sadd.s32 1, %s2389_s17   ;;  %s2823_s12 = smov %s2373_s13 }
 0x1ea   : > { %p17_p5 = scmp.ge.s32.totalorder %s20_s17, 4   ;;  %s2824_s13 = smov %s2377_s14 }
 0x1eb   : > { %s2825_s14 = smov %s2522_s5  ;;  %s2826_s15 = smov %s2385_s16 }
 0x1ec   : > { %s2827_s16 = smov %s2829_s28  ;;  %19 = sbr.rel (!%p17_p5) target bundleno = 7 (0x7), region = 85 }
 0x1f3   :  { %1561 = vsyncpa [#allocation3], 1 }
 0x1f4   :  { %1563 = vsyncpa [#allocation3 + $0x1], 1 }
 0x1f5   :  { %1564 = vsyncpa [#allocation6], 1 }
 0x1f6   :  { %1565 = vsyncpa [#allocation4], 1 }
 0x1f7   :  { %1567 = vsyncpa [#allocation4 + $0x1], 1 }

</bundles_post_ra>
